<compile_context>
chip_gen: v7x
topology: tpu7x:2x2x1
jax: 0.10.0
libtpu: 0.0.40
codegen_flags: <defaults>
</compile_context>

<pallas_src>
import jax
import jax.numpy as jnp
from jax import lax
from jax.experimental import pallas as pl
from jax.experimental.pallas import tpu as pltpu


# ----------------------------------------------------------------------------
# helpers
# ----------------------------------------------------------------------------
def _mosaic_params(nbytes, semantics=None):
    """CompilerParams with a VMEM budget sized to the resident set (+margin)."""
    budget = int(min(max(2 * nbytes + (1 << 20), 2 << 20), 48 << 20))
    if semantics is None:
        return pltpu.CompilerParams(vmem_limit_bytes=budget)
    return pltpu.CompilerParams(dimension_semantics=semantics,
                                vmem_limit_bytes=budget)


def _row_tile(n):
    """Largest 8-aligned row-tile that divides n (n itself if nothing fits)."""
    for cand in (512, 256, 128, 64, 32, 16, 8):
        if cand <= n and n % cand == 0:
            return cand
    return n


# ----------------------------------------------------------------------------
# kernel 1: embedding gather (manual DMA) + batched layer-0 input projection
# ----------------------------------------------------------------------------
def _make_embed_project_kernel(TB, V):
    def kernel(tok_ref, emb_hbm, w_ih0_ref, b0_ref, gx_ref, emb_buf, sems):
        # tok_ref : SMEM (TB,) int32        emb_hbm : HBM (V, E)
        # w_ih0   : VMEM (E, 4H)            b0      : VMEM (1, 4H)
        # gx_ref  : VMEM out (TB, 4H)       emb_buf : VMEM scratch (TB, E)
        # sems    : DMA semaphores (TB,)

        # Issue all row-gather DMAs (embedding table never enters VMEM wholesale).
        @pl.loop(0, TB)
        def _(i):
            # TODO(synk): out-of-range ids are clamped; PyTorch nn.Embedding raises.
            row = jnp.clip(tok_ref[i], 0, V - 1)
            pltpu.make_async_copy(
                emb_hbm.at[pl.ds(row, 1), :],
                emb_buf.at[pl.ds(i, 1), :],
                sems.at[i],
            ).start()

        @pl.loop(0, TB)
        def _(i):
            pltpu.make_async_copy(
                emb_hbm.at[pl.ds(0, 1), :],
                emb_buf.at[pl.ds(i, 1), :],
                sems.at[i],
            ).wait()

        # One MXU-friendly (T*B, E) @ (E, 4H) matmul; layer-0 bias folded in once.
        gx_ref[...] = (
            jnp.dot(emb_buf[...], w_ih0_ref[...], preferred_element_type=jnp.float32)
            + b0_ref[...]
        )

    return kernel


# ----------------------------------------------------------------------------
# kernel 2: LSTM recurrence, grid over time, state in resident output blocks
# ----------------------------------------------------------------------------
def _make_lstm_kernel(B, H, L):
    def kernel(gx_ref, w_hh0_ref, w_cat_ref, b_ref, h0_ref, c0_ref,
               h_top_ref, h_n_ref, c_n_ref):
        t = pl.program_id(0)

        @pl.when(t == 0)
        def _():
            h_n_ref[...] = h0_ref[...]
            c_n_ref[...] = c0_ref[...]

        def cell(gates, c_prev):
            # PyTorch gate order: i, f, g, o
            i_g = jax.nn.sigmoid(gates[:, 0 * H:1 * H])
            f_g = jax.nn.sigmoid(gates[:, 1 * H:2 * H])
            g_g = jnp.tanh(gates[:, 2 * H:3 * H])
            o_g = jax.nn.sigmoid(gates[:, 3 * H:4 * H])
            c_new = f_g * c_prev + i_g * g_g
            h_new = o_g * jnp.tanh(c_new)
            return h_new, c_new

        # Layer 0: x @ W_ih (+ bias) precomputed in kernel 1 -> only h @ W_hh here.
        gates0 = gx_ref[0] + jnp.dot(h_n_ref[0], w_hh0_ref[...],
                                     preferred_element_type=jnp.float32)
        h_new, c_new = cell(gates0, c_n_ref[0])
        h_n_ref[0] = h_new
        c_n_ref[0] = c_new

        # Layers 1..L-1: single fused [x, h_prev] @ [W_ih; W_hh] matmul per cell.
        def layer_body(l, x):
            xh = jnp.concatenate([x, h_n_ref[l]], axis=-1)          # (B, 2H)
            gates = (jnp.dot(xh, w_cat_ref[l - 1],
                             preferred_element_type=jnp.float32) + b_ref[l])
            h_l, c_l = cell(gates, c_n_ref[l])
            h_n_ref[l] = h_l
            c_n_ref[l] = c_l
            return h_l

        x_top = lax.fori_loop(1, L, layer_body, h_new, unroll=True)
        h_top_ref[0] = x_top                                        # (1, B, H) block

    return kernel


# ----------------------------------------------------------------------------
# kernel 3: fc + log-softmax over all T*B rows at once (tiled over rows)
# ----------------------------------------------------------------------------
def _fc_logsoftmax_kernel(h_ref, fcw_ref, fcb_ref, out_ref):
    logits = (jnp.dot(h_ref[...], fcw_ref[...], preferred_element_type=jnp.float32)
              + fcb_ref[...])
    m = jnp.max(logits, axis=-1, keepdims=True)
    lse = m + jnp.log(jnp.sum(jnp.exp(logits - m), axis=-1, keepdims=True))
    out_ref[...] = logits - lse


# ----------------------------------------------------------------------------
# wrapper
# ----------------------------------------------------------------------------
@jax.jit
def decoder_forward(tokens, emb_tbl, w_ih0, w_ihr, w_hh, b, fcw, fcb, h0, c0):
    """DecoderModel forward (lengths=None, eval mode).

    tokens : (B, T) int32
    emb_tbl: (V, E)      w_ih0: (E, 4H)     w_ihr: (max(L-1,1), H, 4H)
    w_hh   : (L, H, 4H)  b:     (L, 1, 4H)  fcw:   (H, V)   fcb: (1, V)
    h0, c0 : (L, B, H)
    returns: logp (B, T, V), h_n (L, B, H), c_n (L, B, H)
    """
    B, T = tokens.shape
    V, E = emb_tbl.shape
    L, H, H4 = w_hh.shape
    assert H4 == 4 * H
    TB = T * B
    Lm1 = max(L - 1, 1)

    # time-major flattened tokens: index i = t*B + b
    tok_tb = jnp.transpose(tokens).reshape(TB).astype(jnp.int32)

    # fused per-layer weights for layers >= 1:  [W_ih; W_hh] -> (2H, 4H)
    if L > 1:
        w_cat = jnp.concatenate([w_ihr[:L - 1], w_hh[1:]], axis=1)  # (L-1, 2H, 4H)
    else:
        w_cat = jnp.zeros((1, 2 * H, 4 * H), jnp.float32)
    b0 = b[0]                                                       # (1, 4H)

    vmem = pl.BlockSpec(memory_space=pltpu.MemorySpace.VMEM)
    smem = pl.BlockSpec(memory_space=pltpu.MemorySpace.SMEM)
    anyspace = pl.BlockSpec(memory_space=pl.ANY)

    # ---- kernel 1: gather + input projection -------------------------------
    k1_bytes = 4 * (2 * TB * E + TB * 4 * H + E * 4 * H + 4 * H)
    gx = pl.pallas_call(
        _make_embed_project_kernel(TB, V),
        out_shape=jax.ShapeDtypeStruct((TB, 4 * H), jnp.float32),
        in_specs=[smem, anyspace, vmem, vmem],
        out_specs=vmem,
        scratch_shapes=[
            pltpu.VMEM((TB, E), jnp.float32),
            pltpu.SemaphoreType.DMA((TB,)),
        ],
        compiler_params=_mosaic_params(k1_bytes),
    )(tok_tb, emb_tbl, w_ih0, b0)
    gx = gx.reshape(T, B, 4 * H)

    # ---- kernel 2: recurrence ----------------------------------------------
    k2_bytes = 4 * (2 * B * 4 * H + H * 4 * H + Lm1 * 2 * H * 4 * H + L * 4 * H
                    + 4 * L * B * H + 2 * B * H)
    h_top, h_n, c_n = pl.pallas_call(
        _make_lstm_kernel(B, H, L),
        grid=(T,),
        out_shape=(
            jax.ShapeDtypeStruct((T, B, H), jnp.float32),
            jax.ShapeDtypeStruct((L, B, H), jnp.float32),
            jax.ShapeDtypeStruct((L, B, H), jnp.float32),
        ),
        in_specs=[
            pl.BlockSpec((1, B, 4 * H), lambda t: (t, 0, 0)),       # gates_x, per step
            pl.BlockSpec((H, 4 * H), lambda t: (0, 0)),             # W_hh layer 0
            pl.BlockSpec((Lm1, 2 * H, 4 * H), lambda t: (0, 0, 0)), # fused weights
            pl.BlockSpec((L, 1, 4 * H), lambda t: (0, 0, 0)),       # biases
            pl.BlockSpec((L, B, H), lambda t: (0, 0, 0)),           # h0
            pl.BlockSpec((L, B, H), lambda t: (0, 0, 0)),           # c0
        ],
        out_specs=(
            pl.BlockSpec((1, B, H), lambda t: (t, 0, 0)),           # top-layer h_t
            pl.BlockSpec((L, B, H), lambda t: (0, 0, 0)),           # resident h state
            pl.BlockSpec((L, B, H), lambda t: (0, 0, 0)),           # resident c state
        ),
        compiler_params=_mosaic_params(k2_bytes, ("arbitrary",)),
    )(gx, w_hh[0], w_cat, b, h0, c0)

    # ---- kernel 3: fc + log-softmax, batched over all T*B rows -------------
    tm = _row_tile(TB)
    k3_bytes = 4 * (2 * tm * H + H * V + V + 2 * tm * V)
    logp_tb = pl.pallas_call(
        _fc_logsoftmax_kernel,
        grid=(TB // tm,),
        out_shape=jax.ShapeDtypeStruct((TB, V), jnp.float32),
        in_specs=[
            pl.BlockSpec((tm, H), lambda i: (i, 0)),
            pl.BlockSpec((H, V), lambda i: (0, 0)),
            pl.BlockSpec((1, V), lambda i: (0, 0)),
        ],
        out_specs=pl.BlockSpec((tm, V), lambda i: (i, 0)),
        compiler_params=_mosaic_params(k3_bytes, ("parallel",)),
    )(h_top.reshape(TB, H), fcw, fcb)

    # layout plumbing back to batch_first (B, T, V)
    logp = jnp.transpose(logp_tb.reshape(T, B, V), (1, 0, 2))
    return logp, h_n, c_n


# ----------------------------------------------------------------------------
# pure-JAX reference (identical math) for correctness checking
# ----------------------------------------------------------------------------
def decoder_forward_ref(tokens, emb_tbl, w_ih0, w_ihr, w_hh, b, fcw, fcb, h0, c0):
    B, T = tokens.shape
    L, H, _ = w_hh.shape
    emb = emb_tbl[tokens]                                           # (B, T, E)
    h = [h0[l] for l in range(L)]
    c = [c0[l] for l in range(L)]
    outs = []
    for t in range(T):
        layer_in = emb[:, t, :]
        for l in range(L):
            w_in = w_ih0 if l == 0 else w_ihr[l - 1]
            gates = layer_in @ w_in + h[l] @ w_hh[l] + b[l]
            i_g = jax.nn.sigmoid(gates[:, 0 * H:1 * H])
            f_g = jax.nn.sigmoid(gates[:, 1 * H:2 * H])
            g_g = jnp.tanh(gates[:, 2 * H:3 * H])
            o_g = jax.nn.sigmoid(gates[:, 3 * H:4 * H])
            c[l] = f_g * c[l] + i_g * g_g
            h[l] = o_g * jnp.tanh(c[l])
            layer_in = h[l]
        logits = layer_in @ fcw + fcb
        outs.append(jax.nn.log_softmax(logits, axis=-1))
    logp = jnp.stack(outs, axis=1)                                  # (B, T, V)
    return logp, jnp.stack(h, axis=0), jnp.stack(c, axis=0)


def init_params(key, V, E, H, L):
    """Deterministic synthetic parameters (uniform, PyTorch-like scale)."""
    k = 1.0 / jnp.sqrt(jnp.float32(H))
    keys = jax.random.split(key, 8)
    emb_tbl = jax.random.normal(keys[0], (V, E), jnp.float32) * 0.5
    w_ih0 = jax.random.uniform(keys[1], (E, 4 * H), jnp.float32, -k, k)
    w_ihr = jax.random.uniform(keys[2], (max(L - 1, 1), H, 4 * H), jnp.float32, -k, k)
    w_hh = jax.random.uniform(keys[3], (L, H, 4 * H), jnp.float32, -k, k)
    b_ih = jax.random.uniform(keys[4], (L, 1, 4 * H), jnp.float32, -k, k)
    b_hh = jax.random.uniform(keys[5], (L, 1, 4 * H), jnp.float32, -k, k)
    b = b_ih + b_hh                                                 # combined bias
    fcw = jax.random.uniform(keys[6], (H, V), jnp.float32, -k, k)
    fcb = jax.random.uniform(keys[7], (1, V), jnp.float32, -k, k)
    return emb_tbl, w_ih0, w_ihr, w_hh, b, fcw, fcb


if __name__ == "__main__":
    # Small shapes consistent with the module's forward:
    #   x: (B, T) int token ids, states: (h0, c0) each (L, B, H)
    B, T = 2, 8
    V, E, H, L = 64, 16, 32, 2

    root = jax.random.PRNGKey(0)
    k_tok, k_h, k_c, k_par = jax.random.split(root, 4)

    tokens = jax.random.randint(k_tok, (B, T), 0, V, dtype=jnp.int32)
    h0 = jax.random.normal(k_h, (L, B, H), jnp.float32) * 0.1
    c0 = jax.random.normal(k_c, (L, B, H), jnp.float32) * 0.1
    params = init_params(k_par, V, E, H, L)

    logp, h_n, c_n = decoder_forward(tokens, *params, h0, c0)
    jax.block_until_ready((logp, h_n, c_n))

    # correctness check vs. pure-JAX reference
    logp_r, h_r, c_r = decoder_forward_ref(tokens, *params, h0, c0)
    assert logp.shape == (B, T, V) and h_n.shape == (L, B, H) and c_n.shape == (L, B, H)
    assert jnp.allclose(logp, logp_r, atol=2e-3, rtol=2e-3)
    assert jnp.allclose(h_n, h_r, atol=2e-3, rtol=2e-3)
    assert jnp.allclose(c_n, c_r, atol=2e-3, rtol=2e-3)
    # log-softmax rows must normalize
    assert jnp.allclose(jnp.exp(logp).sum(-1), 1.0, atol=1e-3)

    print("KERNEL_OK")
</pallas_src>

<mosaic_0001>
module attributes {stable_mosaic.version = 11 : i64} {
  func.func @kernel(%arg0: memref<16xi32, #tpu.memory_space<smem>>, %arg1: memref<64x16xf32, #tpu.memory_space<any>>, %arg2: memref<16x128xf32, #tpu.memory_space<vmem>>, %arg3: memref<1x128xf32, #tpu.memory_space<vmem>>, %arg4: memref<16x128xf32, #tpu.memory_space<vmem>>, %arg5: memref<16x16xf32, #tpu.memory_space<vmem>>, %arg6: memref<16x!tpu.dma_semaphore, #tpu.memory_space<semaphore_mem>>) attributes {dimension_semantics = [], scalar_prefetch = 0 : i64, scratch_operands = 2 : i64, tpu.core_type = #tpu.core_type<tc>} {
    %c0_i32 = arith.constant 0 : i32
    %c16_i32 = arith.constant 16 : i32
    %0 = arith.addi %c0_i32, %c16_i32 : i32
    %c1_i32 = arith.constant 1 : i32
    scf.for %arg7 = %c0_i32 to %0 step %c1_i32  : i32 {
      %c1_i32_12 = arith.constant 1 : i32
      %9 = arith.muli %arg7, %c1_i32_12 : i32
      %c0_i32_13 = arith.constant 0 : i32
      %10 = arith.addi %c0_i32_13, %9 : i32
      %11 = arith.index_cast %10 : i32 to index
      %12 = memref.load %arg0[%11] : memref<16xi32, #tpu.memory_space<smem>>
      %c0_i32_14 = arith.constant 0 : i32
      %c63_i32 = arith.constant 63 : i32
      %13 = arith.maxsi %c0_i32_14, %12 : i32
      %14 = arith.minsi %c63_i32, %13 : i32
      %c0_i32_15 = arith.constant 0 : i32
      %15 = tpu.memref_slice %arg1[%14, %c0_i32_15] : memref<64x16xf32, #tpu.memory_space<any>> -> memref<1x16xf32, #tpu.memory_space<any>>
      %c0_i32_16 = arith.constant 0 : i32
      %16 = tpu.memref_slice %arg5[%10, %c0_i32_16] : memref<16x16xf32, #tpu.memory_space<vmem>> -> memref<1x16xf32, #tpu.memory_space<vmem>>
      %17 = tpu.memref_slice %arg6[%10] : memref<16x!tpu.dma_semaphore, #tpu.memory_space<semaphore_mem>> -> memref<1x!tpu.dma_semaphore, #tpu.memory_space<semaphore_mem>>
      %18 = tpu.memref_squeeze %17 : memref<1x!tpu.dma_semaphore, #tpu.memory_space<semaphore_mem>> -> memref<!tpu.dma_semaphore, #tpu.memory_space<semaphore_mem>>
      tpu.enqueue_dma source(%15 : memref<1x16xf32, #tpu.memory_space<any>>) target(%16 : memref<1x16xf32, #tpu.memory_space<vmem>>) target_semaphore(%18 : memref<!tpu.dma_semaphore, #tpu.memory_space<semaphore_mem>>)
    }
    %c16_i32_0 = arith.constant 16 : i32
    %c0_i32_1 = arith.constant 0 : i32
    %c16_i32_2 = arith.constant 16 : i32
    %1 = arith.addi %c0_i32_1, %c16_i32_2 : i32
    %c1_i32_3 = arith.constant 1 : i32
    scf.for %arg7 = %c0_i32_1 to %1 step %c1_i32_3  : i32 {
      %c1_i32_12 = arith.constant 1 : i32
      %9 = arith.muli %arg7, %c1_i32_12 : i32
      %c0_i32_13 = arith.constant 0 : i32
      %10 = arith.addi %c0_i32_13, %9 : i32
      %c0_i32_14 = arith.constant 0 : i32
      %c0_i32_15 = arith.constant 0 : i32
      %11 = tpu.memref_slice %arg1[%c0_i32_14, %c0_i32_15] : memref<64x16xf32, #tpu.memory_space<any>> -> memref<1x16xf32, #tpu.memory_space<any>>
      %c0_i32_16 = arith.constant 0 : i32
      %12 = tpu.memref_slice %arg5[%10, %c0_i32_16] : memref<16x16xf32, #tpu.memory_space<vmem>> -> memref<1x16xf32, #tpu.memory_space<vmem>>
      %13 = tpu.memref_slice %arg6[%10] : memref<16x!tpu.dma_semaphore, #tpu.memory_space<semaphore_mem>> -> memref<1x!tpu.dma_semaphore, #tpu.memory_space<semaphore_mem>>
      %14 = tpu.memref_squeeze %13 : memref<1x!tpu.dma_semaphore, #tpu.memory_space<semaphore_mem>> -> memref<!tpu.dma_semaphore, #tpu.memory_space<semaphore_mem>>
      tpu.wait_dma2 semaphore(%14 : memref<!tpu.dma_semaphore, #tpu.memory_space<semaphore_mem>>) src(%11 : memref<1x16xf32, #tpu.memory_space<any>>) dst(%12 : memref<1x16xf32, #tpu.memory_space<vmem>>)
    }
    %c16_i32_4 = arith.constant 16 : i32
    %c0 = arith.constant 0 : index
    %c0_5 = arith.constant 0 : index
    %2 = vector.load %arg5[%c0, %c0_5] : memref<16x16xf32, #tpu.memory_space<vmem>>, vector<16x16xf32>
    %c0_6 = arith.constant 0 : index
    %c0_7 = arith.constant 0 : index
    %3 = vector.load %arg2[%c0_6, %c0_7] : memref<16x128xf32, #tpu.memory_space<vmem>>, vector<16x128xf32>
    %cst = arith.constant dense<0.000000e+00> : vector<16x128xf32>
    %4 = tpu.matmul %2, %3, %cst {dimension_numbers = #tpu.dot_dimension_numbers<[1], [0], [0], [1], [0, 0, 1, 1], [], []>} : vector<16x16xf32>, vector<16x128xf32>, vector<16x128xf32> -> vector<16x128xf32>
    %c0_8 = arith.constant 0 : index
    %c0_9 = arith.constant 0 : index
    %5 = vector.load %arg3[%c0_8, %c0_9] : memref<1x128xf32, #tpu.memory_space<vmem>>, vector<1x128xf32>
    %6 = vector.broadcast %5 : vector<1x128xf32> to vector<16x128xf32>
    %7 = arith.addf %4, %6 : vector<16x128xf32>
    %c0_10 = arith.constant 0 : index
    %c0_11 = arith.constant 0 : index
    %8 = vector.load %arg4[%c0_10, %c0_11] : memref<16x128xf32, #tpu.memory_space<vmem>>, vector<16x128xf32>
    tpu.vector_store %arg4[%c0_10, %c0_11], %7 {strides = array<i32>} : memref<16x128xf32, #tpu.memory_space<vmem>>, vector<16x128xf32>,
    return
  }
}

module attributes {stable_mosaic.version = 11 : i64} {
  func.func @_fc_logsoftmax_kernel(%arg0: i32, %arg1: memref<16x32xf32, #tpu.memory_space<vmem>>, %arg2: memref<32x64xf32, #tpu.memory_space<vmem>>, %arg3: memref<1x64xf32, #tpu.memory_space<vmem>>, %arg4: memref<16x64xf32, #tpu.memory_space<vmem>>) attributes {dimension_semantics = [#tpu.dimension_semantics<parallel>], iteration_bounds = array<i64: 1>, scalar_prefetch = 0 : i64, scratch_operands = 0 : i64, tpu.core_type = #tpu.core_type<tc>, window_params = [{transform_indices = @transform_0, window_bounds = array<i64: 16, 32>}, {pipeline_mode = #tpu.pipeline_mode<synchronous>, transform_indices = @transform_1, window_bounds = array<i64: 32, 64>}, {pipeline_mode = #tpu.pipeline_mode<synchronous>, transform_indices = @transform_2, window_bounds = array<i64: 1, 64>}, {transform_indices = @transform_3, window_bounds = array<i64: 16, 64>}]} {
    %c0 = arith.constant 0 : index
    %c0_0 = arith.constant 0 : index
    %0 = vector.load %arg1[%c0, %c0_0] : memref<16x32xf32, #tpu.memory_space<vmem>>, vector<16x32xf32>
    %c0_1 = arith.constant 0 : index
    %c0_2 = arith.constant 0 : index
    %1 = vector.load %arg2[%c0_1, %c0_2] : memref<32x64xf32, #tpu.memory_space<vmem>>, vector<32x64xf32>
    %cst = arith.constant dense<0.000000e+00> : vector<16x64xf32>
    %2 = tpu.matmul %0, %1, %cst {dimension_numbers = #tpu.dot_dimension_numbers<[1], [0], [0], [1], [0, 0, 1, 1], [], []>} : vector<16x32xf32>, vector<32x64xf32>, vector<16x64xf32> -> vector<16x64xf32>
    %c0_3 = arith.constant 0 : index
    %c0_4 = arith.constant 0 : index
    %3 = vector.load %arg3[%c0_3, %c0_4] : memref<1x64xf32, #tpu.memory_space<vmem>>, vector<1x64xf32>
    %4 = vector.broadcast %3 : vector<1x64xf32> to vector<16x64xf32>
    %5 = arith.addf %2, %4 : vector<16x64xf32>
    %cst_5 = arith.constant dense<0xFF800000> : vector<16xf32>
    %6 = vector.multi_reduction <maximumf>, %5, %cst_5 [1] : vector<16x64xf32> to vector<16xf32>
    %7 = vector.shape_cast %6 : vector<16xf32> to vector<16x1xf32>
    %8 = vector.broadcast %7 : vector<16x1xf32> to vector<16x64xf32>
    %9 = arith.subf %5, %8 : vector<16x64xf32>
    %10 = math.exp %9 : vector<16x64xf32>
    %cst_6 = arith.constant dense<0.000000e+00> : vector<16xf32>
    %11 = vector.multi_reduction <add>, %10, %cst_6 [1] : vector<16x64xf32> to vector<16xf32>
    %12 = vector.shape_cast %11 : vector<16xf32> to vector<16x1xf32>
    %13 = math.log %12 : vector<16x1xf32>
    %14 = arith.addf %7, %13 : vector<16x1xf32>
    %15 = vector.broadcast %14 : vector<16x1xf32> to vector<16x64xf32>
    %16 = arith.subf %5, %15 : vector<16x64xf32>
    %c0_7 = arith.constant 0 : index
    %c0_8 = arith.constant 0 : index
    %17 = vector.load %arg4[%c0_7, %c0_8] : memref<16x64xf32, #tpu.memory_space<vmem>>, vector<16x64xf32>
    tpu.vector_store %arg4[%c0_7, %c0_8], %16 {strides = array<i32>} : memref<16x64xf32, #tpu.memory_space<vmem>>, vector<16x64xf32>,
    return
  }
  func.func @transform_0(%arg0: i32) -> (i32, i32) {
    %c0_i32 = arith.constant 0 : i32
    %c0_i32_0 = arith.constant 0 : i32
    return %arg0, %c0_i32 : i32, i32
  }
  func.func @transform_1(%arg0: i32) -> (i32, i32) {
    %c0_i32 = arith.constant 0 : i32
    %c0_i32_0 = arith.constant 0 : i32
    %c0_i32_1 = arith.constant 0 : i32
    return %c0_i32, %c0_i32_0 : i32, i32
  }
  func.func @transform_2(%arg0: i32) -> (i32, i32) {
    %c0_i32 = arith.constant 0 : i32
    %c0_i32_0 = arith.constant 0 : i32
    %c0_i32_1 = arith.constant 0 : i32
    return %c0_i32, %c0_i32_0 : i32, i32
  }
  func.func @transform_3(%arg0: i32) -> (i32, i32) {
    %c0_i32 = arith.constant 0 : i32
    %c0_i32_0 = arith.constant 0 : i32
    return %arg0, %c0_i32 : i32, i32
  }
}

module attributes {stable_mosaic.version = 11 : i64} {
  func.func @kernel(%arg0: i32, %arg1: memref<1x2x128xf32, #tpu.memory_space<vmem>>, %arg2: memref<32x128xf32, #tpu.memory_space<vmem>>, %arg3: memref<1x64x128xf32, #tpu.memory_space<vmem>>, %arg4: memref<2x1x128xf32, #tpu.memory_space<vmem>>, %arg5: memref<2x2x32xf32, #tpu.memory_space<vmem>>, %arg6: memref<2x2x32xf32, #tpu.memory_space<vmem>>, %arg7: memref<1x2x32xf32, #tpu.memory_space<vmem>>, %arg8: memref<2x2x32xf32, #tpu.memory_space<vmem>>, %arg9: memref<2x2x32xf32, #tpu.memory_space<vmem>>) attributes {dimension_semantics = [#tpu.dimension_semantics<arbitrary>], iteration_bounds = array<i64: 8>, scalar_prefetch = 0 : i64, scratch_operands = 0 : i64, tpu.core_type = #tpu.core_type<tc>, window_params = [{transform_indices = @transform_0, window_bounds = array<i64: 1, 2, 128>}, {pipeline_mode = #tpu.pipeline_mode<synchronous>, transform_indices = @transform_1, window_bounds = array<i64: 32, 128>}, {pipeline_mode = #tpu.pipeline_mode<synchronous>, transform_indices = @transform_2, window_bounds = array<i64: 1, 64, 128>}, {pipeline_mode = #tpu.pipeline_mode<synchronous>, transform_indices = @transform_3, window_bounds = array<i64: 2, 1, 128>}, {pipeline_mode = #tpu.pipeline_mode<synchronous>, transform_indices = @transform_4, window_bounds = array<i64: 2, 2, 32>}, {pipeline_mode = #tpu.pipeline_mode<synchronous>, transform_indices = @transform_5, window_bounds = array<i64: 2, 2, 32>}, {transform_indices = @transform_6, window_bounds = array<i64: 1, 2, 32>}, {pipeline_mode = #tpu.pipeline_mode<synchronous>, transform_indices = @transform_7, window_bounds = array<i64: 2, 2, 32>}, {pipeline_mode = #tpu.pipeline_mode<synchronous>, transform_indices = @transform_8, window_bounds = array<i64: 2, 2, 32>}]} {
    %c0_i32 = arith.constant 0 : i32
    %0 = arith.cmpi eq, %arg0, %c0_i32 : i32
    %1 = arith.extui %0 : i1 to i32
    %c0_i32_0 = arith.constant 0 : i32
    %2 = arith.cmpi ne, %1, %c0_i32_0 : i32
    scf.if %2 {
      %c0_41 = arith.constant 0 : index
      %c0_42 = arith.constant 0 : index
      %c0_43 = arith.constant 0 : index
      %96 = vector.load %arg5[%c0_41, %c0_42, %c0_43] : memref<2x2x32xf32, #tpu.memory_space<vmem>>, vector<2x2x32xf32>
      %c0_44 = arith.constant 0 : index
      %c0_45 = arith.constant 0 : index
      %c0_46 = arith.constant 0 : index
      %97 = vector.load %arg8[%c0_44, %c0_45, %c0_46] : memref<2x2x32xf32, #tpu.memory_space<vmem>>, vector<2x2x32xf32>
      tpu.vector_store %arg8[%c0_44, %c0_45, %c0_46], %96 {strides = array<i32>} : memref<2x2x32xf32, #tpu.memory_space<vmem>>, vector<2x2x32xf32>,
      %c0_47 = arith.constant 0 : index
      %c0_48 = arith.constant 0 : index
      %c0_49 = arith.constant 0 : index
      %98 = vector.load %arg6[%c0_47, %c0_48, %c0_49] : memref<2x2x32xf32, #tpu.memory_space<vmem>>, vector<2x2x32xf32>
      %c0_50 = arith.constant 0 : index
      %c0_51 = arith.constant 0 : index
      %c0_52 = arith.constant 0 : index
      %99 = vector.load %arg9[%c0_50, %c0_51, %c0_52] : memref<2x2x32xf32, #tpu.memory_space<vmem>>, vector<2x2x32xf32>
      tpu.vector_store %arg9[%c0_50, %c0_51, %c0_52], %98 {strides = array<i32>} : memref<2x2x32xf32, #tpu.memory_space<vmem>>, vector<2x2x32xf32>,
    } else {
    }
    %c0 = arith.constant 0 : index
    %c0_1 = arith.constant 0 : index
    %c0_2 = arith.constant 0 : index
    %3 = vector.load %arg1[%c0, %c0_1, %c0_2] : memref<1x2x128xf32, #tpu.memory_space<vmem>>, vector<1x2x128xf32>
    %4 = vector.shape_cast %3 : vector<1x2x128xf32> to vector<2x128xf32>
    %c0_3 = arith.constant 0 : index
    %c0_4 = arith.constant 0 : index
    %c0_5 = arith.constant 0 : index
    %5 = vector.load %arg8[%c0_3, %c0_4, %c0_5] : memref<2x2x32xf32, #tpu.memory_space<vmem>>, vector<1x2x32xf32>
    %6 = vector.shape_cast %5 : vector<1x2x32xf32> to vector<2x32xf32>
    %c0_6 = arith.constant 0 : index
    %c0_7 = arith.constant 0 : index
    %7 = vector.load %arg2[%c0_6, %c0_7] : memref<32x128xf32, #tpu.memory_space<vmem>>, vector<32x128xf32>
    %cst = arith.constant dense<0.000000e+00> : vector<2x128xf32>
    %8 = tpu.matmul %6, %7, %cst {dimension_numbers = #tpu.dot_dimension_numbers<[1], [0], [0], [1], [0, 0, 1, 1], [], []>} : vector<2x32xf32>, vector<32x128xf32>, vector<2x128xf32> -> vector<2x128xf32>
    %9 = arith.addf %4, %8 : vector<2x128xf32>
    %c0_8 = arith.constant 0 : index
    %c0_9 = arith.constant 0 : index
    %c0_10 = arith.constant 0 : index
    %10 = vector.load %arg9[%c0_8, %c0_9, %c0_10] : memref<2x2x32xf32, #tpu.memory_space<vmem>>, vector<1x2x32xf32>
    %11 = vector.shape_cast %10 : vector<1x2x32xf32> to vector<2x32xf32>
    %12 = vector.extract_strided_slice %9 {offsets = [0, 0], sizes = [2, 32], strides = [1, 1]} : vector<2x128xf32> to vector<2x32xf32>
    %13 = arith.negf %12 : vector<2x32xf32>
    %14 = math.exp %13 : vector<2x32xf32>
    %cst_11 = arith.constant 1.000000e+00 : f32
    %15 = vector.broadcast %cst_11 : f32 to vector<2x32xf32>
    %16 = arith.addf %15, %14 : vector<2x32xf32>
    %17 = arith.divf %15, %16 : vector<2x32xf32>
    %18 = vector.extract_strided_slice %9 {offsets = [0, 32], sizes = [2, 32], strides = [1, 1]} : vector<2x128xf32> to vector<2x32xf32>
    %19 = arith.negf %18 : vector<2x32xf32>
    %20 = math.exp %19 : vector<2x32xf32>
    %cst_12 = arith.constant 1.000000e+00 : f32
    %21 = vector.broadcast %cst_12 : f32 to vector<2x32xf32>
    %22 = arith.addf %21, %20 : vector<2x32xf32>
    %23 = arith.divf %21, %22 : vector<2x32xf32>
    %24 = vector.extract_strided_slice %9 {offsets = [0, 64], sizes = [2, 32], strides = [1, 1]} : vector<2x128xf32> to vector<2x32xf32>
    %25 = math.tanh %24 : vector<2x32xf32>
    %26 = vector.extract_strided_slice %9 {offsets = [0, 96], sizes = [2, 32], strides = [1, 1]} : vector<2x128xf32> to vector<2x32xf32>
    %27 = arith.negf %26 : vector<2x32xf32>
    %28 = math.exp %27 : vector<2x32xf32>
    %cst_13 = arith.constant 1.000000e+00 : f32
    %29 = vector.broadcast %cst_13 : f32 to vector<2x32xf32>
    %30 = arith.addf %29, %28 : vector<2x32xf32>
    %31 = arith.divf %29, %30 : vector<2x32xf32>
    %32 = arith.mulf %23, %11 : vector<2x32xf32>
    %33 = arith.mulf %17, %25 : vector<2x32xf32>
    %34 = arith.addf %32, %33 : vector<2x32xf32>
    %35 = math.tanh %34 : vector<2x32xf32>
    %36 = arith.mulf %31, %35 : vector<2x32xf32>
    %c0_14 = arith.constant 0 : index
    %c0_15 = arith.constant 0 : index
    %c0_16 = arith.constant 0 : index
    %37 = vector.load %arg8[%c0_14, %c0_15, %c0_16] : memref<2x2x32xf32, #tpu.memory_space<vmem>>, vector<1x2x32xf32>
    %38 = vector.shape_cast %37 : vector<1x2x32xf32> to vector<2x32xf32>
    %39 = vector.shape_cast %36 : vector<2x32xf32> to vector<1x2x32xf32>
    tpu.vector_store %arg8[%c0_14, %c0_15, %c0_16], %39 {strides = array<i32>} : memref<2x2x32xf32, #tpu.memory_space<vmem>>, vector<1x2x32xf32>,
    %c0_17 = arith.constant 0 : index
    %c0_18 = arith.constant 0 : index
    %c0_19 = arith.constant 0 : index
    %40 = vector.load %arg9[%c0_17, %c0_18, %c0_19] : memref<2x2x32xf32, #tpu.memory_space<vmem>>, vector<1x2x32xf32>
    %41 = vector.shape_cast %40 : vector<1x2x32xf32> to vector<2x32xf32>
    %42 = vector.shape_cast %34 : vector<2x32xf32> to vector<1x2x32xf32>
    tpu.vector_store %arg9[%c0_17, %c0_18, %c0_19], %42 {strides = array<i32>} : memref<2x2x32xf32, #tpu.memory_space<vmem>>, vector<1x2x32xf32>,
    %c1_i32 = arith.constant 1 : i32
    %43 = arith.index_cast %c1_i32 : i32 to index
    %c0_20 = arith.constant 0 : index
    %c0_21 = arith.constant 0 : index
    %44 = vector.load %arg8[%43, %c0_20, %c0_21] : memref<2x2x32xf32, #tpu.memory_space<vmem>>, vector<1x2x32xf32>
    %45 = vector.shape_cast %44 : vector<1x2x32xf32> to vector<2x32xf32>
    %46 = tpu.concatenate %36, %45 in 1 : vector<2x32xf32>, vector<2x32xf32> -> vector<2x64xf32>
    %c1_i32_22 = arith.constant 1 : i32
    %47 = arith.subi %c1_i32, %c1_i32_22 : i32
    %48 = arith.index_cast %47 : i32 to index
    %c0_23 = arith.constant 0 : index
    %c0_24 = arith.constant 0 : index
    %49 = vector.load %arg3[%48, %c0_23, %c0_24] : memref<1x64x128xf32, #tpu.memory_space<vmem>>, vector<1x64x128xf32>
    %50 = vector.shape_cast %49 : vector<1x64x128xf32> to vector<64x128xf32>
    %cst_25 = arith.constant dense<0.000000e+00> : vector<2x128xf32>
    %51 = tpu.matmul %46, %50, %cst_25 {dimension_numbers = #tpu.dot_dimension_numbers<[1], [0], [0], [1], [0, 0, 1, 1], [], []>} : vector<2x64xf32>, vector<64x128xf32>, vector<2x128xf32> -> vector<2x128xf32>
    %52 = arith.index_cast %c1_i32 : i32 to index
    %c0_26 = arith.constant 0 : index
    %c0_27 = arith.constant 0 : index
    %53 = vector.load %arg4[%52, %c0_26, %c0_27] : memref<2x1x128xf32, #tpu.memory_space<vmem>>, vector<1x1x128xf32>
    %54 = vector.shape_cast %53 : vector<1x1x128xf32> to vector<1x128xf32>
    %55 = vector.broadcast %54 : vector<1x128xf32> to vector<2x128xf32>
    %56 = arith.addf %51, %55 : vector<2x128xf32>
    %57 = arith.index_cast %c1_i32 : i32 to index
    %c0_28 = arith.constant 0 : index
    %c0_29 = arith.constant 0 : index
    %58 = vector.load %arg9[%57, %c0_28, %c0_29] : memref<2x2x32xf32, #tpu.memory_space<vmem>>, vector<1x2x32xf32>
    %59 = vector.shape_cast %58 : vector<1x2x32xf32> to vector<2x32xf32>
    %60 = vector.extract_strided_slice %56 {offsets = [0, 0], sizes = [2, 32], strides = [1, 1]} : vector<2x128xf32> to vector<2x32xf32>
    %61 = arith.negf %60 : vector<2x32xf32>
    %62 = math.exp %61 : vector<2x32xf32>
    %cst_30 = arith.constant 1.000000e+00 : f32
    %63 = vector.broadcast %cst_30 : f32 to vector<2x32xf32>
    %64 = arith.addf %63, %62 : vector<2x32xf32>
    %65 = arith.divf %63, %64 : vector<2x32xf32>
    %66 = vector.extract_strided_slice %56 {offsets = [0, 32], sizes = [2, 32], strides = [1, 1]} : vector<2x128xf32> to vector<2x32xf32>
    %67 = arith.negf %66 : vector<2x32xf32>
    %68 = math.exp %67 : vector<2x32xf32>
    %cst_31 = arith.constant 1.000000e+00 : f32
    %69 = vector.broadcast %cst_31 : f32 to vector<2x32xf32>
    %70 = arith.addf %69, %68 : vector<2x32xf32>
    %71 = arith.divf %69, %70 : vector<2x32xf32>
    %72 = vector.extract_strided_slice %56 {offsets = [0, 64], sizes = [2, 32], strides = [1, 1]} : vector<2x128xf32> to vector<2x32xf32>
    %73 = math.tanh %72 : vector<2x32xf32>
    %74 = vector.extract_strided_slice %56 {offsets = [0, 96], sizes = [2, 32], strides = [1, 1]} : vector<2x128xf32> to vector<2x32xf32>
    %75 = arith.negf %74 : vector<2x32xf32>
    %76 = math.exp %75 : vector<2x32xf32>
    %cst_32 = arith.constant 1.000000e+00 : f32
    %77 = vector.broadcast %cst_32 : f32 to vector<2x32xf32>
    %78 = arith.addf %77, %76 : vector<2x32xf32>
    %79 = arith.divf %77, %78 : vector<2x32xf32>
    %80 = arith.mulf %71, %59 : vector<2x32xf32>
    %81 = arith.mulf %65, %73 : vector<2x32xf32>
    %82 = arith.addf %80, %81 : vector<2x32xf32>
    %83 = math.tanh %82 : vector<2x32xf32>
    %84 = arith.mulf %79, %83 : vector<2x32xf32>
    %85 = arith.index_cast %c1_i32 : i32 to index
    %c0_33 = arith.constant 0 : index
    %c0_34 = arith.constant 0 : index
    %86 = vector.load %arg8[%85, %c0_33, %c0_34] : memref<2x2x32xf32, #tpu.memory_space<vmem>>, vector<1x2x32xf32>
    %87 = vector.shape_cast %86 : vector<1x2x32xf32> to vector<2x32xf32>
    %88 = vector.shape_cast %84 : vector<2x32xf32> to vector<1x2x32xf32>
    tpu.vector_store %arg8[%85, %c0_33, %c0_34], %88 {strides = array<i32>} : memref<2x2x32xf32, #tpu.memory_space<vmem>>, vector<1x2x32xf32>,
    %89 = arith.index_cast %c1_i32 : i32 to index
    %c0_35 = arith.constant 0 : index
    %c0_36 = arith.constant 0 : index
    %90 = vector.load %arg9[%89, %c0_35, %c0_36] : memref<2x2x32xf32, #tpu.memory_space<vmem>>, vector<1x2x32xf32>
    %91 = vector.shape_cast %90 : vector<1x2x32xf32> to vector<2x32xf32>
    %92 = vector.shape_cast %82 : vector<2x32xf32> to vector<1x2x32xf32>
    tpu.vector_store %arg9[%89, %c0_35, %c0_36], %92 {strides = array<i32>} : memref<2x2x32xf32, #tpu.memory_space<vmem>>, vector<1x2x32xf32>,
    %c1_i32_37 = arith.constant 1 : i32
    %c0_38 = arith.constant 0 : index
    %c0_39 = arith.constant 0 : index
    %c0_40 = arith.constant 0 : index
    %93 = vector.load %arg7[%c0_38, %c0_39, %c0_40] : memref<1x2x32xf32, #tpu.memory_space<vmem>>, vector<1x2x32xf32>
    %94 = vector.shape_cast %93 : vector<1x2x32xf32> to vector<2x32xf32>
    %95 = vector.shape_cast %84 : vector<2x32xf32> to vector<1x2x32xf32>
    tpu.vector_store %arg7[%c0_38, %c0_39, %c0_40], %95 {strides = array<i32>} : memref<1x2x32xf32, #tpu.memory_space<vmem>>, vector<1x2x32xf32>,
    return
  }
  func.func @transform_0(%arg0: i32) -> (i32, i32, i32) {
    %c0_i32 = arith.constant 0 : i32
    %c0_i32_0 = arith.constant 0 : i32
    %c0_i32_1 = arith.constant 0 : i32
    return %arg0, %c0_i32, %c0_i32_0 : i32, i32, i32
  }
  func.func @transform_1(%arg0: i32) -> (i32, i32) {
    %c0_i32 = arith.constant 0 : i32
    %c0_i32_0 = arith.constant 0 : i32
    %c0_i32_1 = arith.constant 0 : i32
    return %c0_i32, %c0_i32_0 : i32, i32
  }
  func.func @transform_2(%arg0: i32) -> (i32, i32, i32) {
    %c0_i32 = arith.constant 0 : i32
    %c0_i32_0 = arith.constant 0 : i32
    %c0_i32_1 = arith.constant 0 : i32
    %c0_i32_2 = arith.constant 0 : i32
    return %c0_i32, %c0_i32_0, %c0_i32_1 : i32, i32, i32
  }
  func.func @transform_3(%arg0: i32) -> (i32, i32, i32) {
    %c0_i32 = arith.constant 0 : i32
    %c0_i32_0 = arith.constant 0 : i32
    %c0_i32_1 = arith.constant 0 : i32
    %c0_i32_2 = arith.constant 0 : i32
    return %c0_i32, %c0_i32_0, %c0_i32_1 : i32, i32, i32
  }
  func.func @transform_4(%arg0: i32) -> (i32, i32, i32) {
    %c0_i32 = arith.constant 0 : i32
    %c0_i32_0 = arith.constant 0 : i32
    %c0_i32_1 = arith.constant 0 : i32
    %c0_i32_2 = arith.constant 0 : i32
    return %c0_i32, %c0_i32_0, %c0_i32_1 : i32, i32, i32
  }
  func.func @transform_5(%arg0: i32) -> (i32, i32, i32) {
    %c0_i32 = arith.constant 0 : i32
    %c0_i32_0 = arith.constant 0 : i32
    %c0_i32_1 = arith.constant 0 : i32
    %c0_i32_2 = arith.constant 0 : i32
    return %c0_i32, %c0_i32_0, %c0_i32_1 : i32, i32, i32
  }
  func.func @transform_6(%arg0: i32) -> (i32, i32, i32) {
    %c0_i32 = arith.constant 0 : i32
    %c0_i32_0 = arith.constant 0 : i32
    %c0_i32_1 = arith.constant 0 : i32
    return %arg0, %c0_i32, %c0_i32_0 : i32, i32, i32
  }
  func.func @transform_7(%arg0: i32) -> (i32, i32, i32) {
    %c0_i32 = arith.constant 0 : i32
    %c0_i32_0 = arith.constant 0 : i32
    %c0_i32_1 = arith.constant 0 : i32
    %c0_i32_2 = arith.constant 0 : i32
    return %c0_i32, %c0_i32_0, %c0_i32_1 : i32, i32, i32
  }
  func.func @transform_8(%arg0: i32) -> (i32, i32, i32) {
    %c0_i32 = arith.constant 0 : i32
    %c0_i32_0 = arith.constant 0 : i32
    %c0_i32_1 = arith.constant 0 : i32
    %c0_i32_2 = arith.constant 0 : i32
    return %c0_i32, %c0_i32_0, %c0_i32_1 : i32, i32, i32
  }
}

</mosaic_0001>

<bundles_post_ra>
// kernel: decoder_forward.3
= control target key start
LH: loop header
LB: loop body
LE: loop exit
PB: predicated region body
PF: predicated region fallthrough
CT: control target
= control target key end

     0   :  { %9 = vsyncpa [#allocation5], 0  ;;  %s468_s0 = inlined_call_operand.vmem [shape: s32[16], index: 0, kind: input, shape index: {}]   ;;  %s469_s1 = inlined_call_operand.vmem [shape: f32[64,16], index: 1, kind: input, shape index: {}]   ;;  %s470_s2 = inlined_call_operand.vmem [shape: f32[16,128], index: 2, kind: input, shape index: {}]   ;;  %s471_s3 = inlined_call_operand.vmem [shape: f32[1,128], index: 3, kind: input, shape index: {}]   ;;  %s472_s4 = inlined_call_operand.vmem [shape: f32[16,128], index: 4, kind: output, shape index: {}]  }
   0x1   :  { %s16_s17 = sshll.u32 %s468_s0, 4  ;;  %s17_s17 = int_to_ptr.vmem [resolvable:$true] %s16_s17 }
   0x2   :  { %s389_s18 = scalar_lea.vmem %s17_s17, 16  ;;  %p394_p1 = scmp.lt.s32.totalorder %s17_s17, %s17_s17 }
   0x3   :  { %p390_p0 = scmp.ne.s32.totalorder %s17_s17, %s389_s18  ;;  %p395_p2 = scmp.lt.s32.totalorder %s389_s18, %s389_s18 }
   0x5   :  { %p396_p3 = por %p395_p2, %p394_p1 }
   0x7   :  { %p397_p4 = pnand %p396_p3, %p390_p0 }
   0x9   :  { %400 = shalt.err (!%p397_p4)
}
   0xa   :  { %s421_s19 = smov [#allocation4]  }
   0xb   :  { %19 = dma.vmem_to_smem %s17_s17, 16, %s421_s19, [#allocation5]  }
   0xc   :  { %409 = dma.done.wait [#allocation5], 16  }
   0xd   :  { %410 = vsyncadd [#allocation5], 4294967280 }
   0xe   :  { %27 = sfence }
   0xf   :  { %s413_s20 = smov 0  }
  0x10 LB: > { %s34_s21 = sld [smem:[#allocation4 + %s415_s20]]  ;;  %s40_s24 = scalar_lea.vmem [#allocation2], %s415_s20  ;;  %s415_s20 = sphi %s413_s20, %s33_s20  }
  0x11   : > { %s41_s25 = scalar_lea.sflag [#allocation3], %s415_s20 }
  0x16   : > { %p35_p5 = scmp.gt.s32.totalorder %s34_s21, 0  ;;  %p331_p6 = scmp.lt.s32.totalorder %s34_s21, 63 }
  0x18   : > { %s474_s21 = smov (!%p35_p5, %s34_s21), 0 }
  0x19   : > { %s476_s21 = smov (!%p331_p6, %s474_s21), 63 }
  0x1a   : > { %s39_s23 = scalar_lea.vmem %s469_s1, %s476_s21 }
  0x1b   : > { %v59_v0 = vld [vmem:[%s39_s23] sm:$0x1] }
  0x1c   : > { %60 = vst [vmem:[%s40_s24] sm:$0x1] %v59_v0 }
  0x1d   : > { %85 = vsyncadd %s41_s25, 16  ;;  %s33_s20 = sadd.s32 1, %s415_s20  }
  0x1e   : > { %p30_p7 = scmp.ge.s32.totalorder %s33_s20, 16  }
  0x1f   :  { %s417_s26 = smov (%p30_p7), 0  }
  0x20   :  { %32 = sbr.rel (!%p30_p7) target bundleno = 16 (0x10), region = 109 }
  0x27 LB: > { %s92_s27 = scalar_lea.sflag [#allocation3], %s419_s26  ;;  %s419_s26 = sphi %s417_s26, %s91_s26  }
  0x28   : > { %411 = dma.done.wait %s92_s27, 16 }
  0x29   : > { %412 = vsyncadd %s92_s27, 4294967280  ;;  %s91_s26 = sadd.s32 1, %s419_s26  }
  0x2a   : > { %p88_p8 = scmp.ge.s32.totalorder %s91_s26, 16  }
  0x2b   :  { %v98_v1 = vld [vmem:[%s470_s2] sm:$0xff] (%p88_p8)  ;;  %v99_v2 = vld [vmem:[%s470_s2 + $0x8] sm:$0xff] (%p88_p8)  ;;  %vm107_vm0 = vcmask (%p88_p8), 130048  }
  0x2c   :  { %90 = sbr.rel (!%p88_p8) target bundleno = 39 (0x27), region = 120  ;;  %v96_v3 = vld [vmem:[#allocation2] sm:$0xff] (%p88_p8)  ;;  %v368_v4 = vpack.c.bf16 (%p88_p8), %v99_v2, %v98_v1  ;;  %v97_v5 = vld [vmem:[#allocation2 + $0x8] sm:$0xff] (%p88_p8) }
  0x2d   :  { %365 = vmatprep.mubr.msk.f32.mxu0 (%p88_p8), %vm107_vm0, %v96_v3  ;;  %v336_v6 = vld [vmem:[%s471_s3] ss:$0 sm:$0xff] (%p88_p8) }
  0x2e   :  { %369 = vmatprep.subr.bf16.mxu0 (%p88_p8), %v368_v4 }
  0x2f   :  { %371 = vmatpush3.bf16.msra.mxu0 (%p88_p8), %v368_v4 }
  0x32   :  { %366 = vmatmul.mubr.msk.f32.vlgmr.msra.gmra.mrb[0].mxu0 (%p88_p8), %vm107_vm0, %v97_v5 }
 0x105   :  { %v367_v7 = vpop.f32.mrb[0].mxu0 }
 0x106   :  { %v186_v8 = vadd.f32 %v367_v7, %v336_v6  ;;  %v180_v9 = vpop.f32.mrb[1].mxu0 }
 0x107   :  { %v181_v10 = vadd.f32 %v336_v6, %v180_v9 }
 0x108   :  { %190 = vst [vmem:[%s472_s4 + $0x8] sm:$0xff] %v186_v8 }
 0x109   :  { %189 = vst [vmem:[%s472_s4] sm:$0xff] %v181_v10 }
 0x10a   :  { %195 = vsyncpa [#allocation5], 1 }
 0x10b   :  { %196 = vsyncmov [#allocation3] }
 0x10e   :  { %s197_s10 = vpop.sfrf %196 }
 0x10f   :  { %p339_p9 = scmp.ne.s32.totalorder %s197_s10, 0 }
 0x111   :  { %201 = shalt.err (%p339_p9)  }
 0x112   :  { %203 = vsyncmov [#allocation3 + $0x1] }
 0x115   :  { %s204_s11 = vpop.sfrf %203 }
 0x116   :  { %p340_p10 = scmp.ne.s32.totalorder %s204_s11, 0 }
 0x118   :  { %208 = shalt.err (%p340_p10)  }
 0x119   :  { %210 = vsyncmov [#allocation3 + $0x2] }
 0x11c   :  { %s211_s3 = vpop.sfrf %210 }
 0x11d   :  { %p341_p11 = scmp.ne.s32.totalorder %s211_s3, 0 }
 0x11f   :  { %215 = shalt.err (%p341_p11)  }
 0x120   :  { %217 = vsyncmov [#allocation3 + $0x3] }
 0x123   :  { %s218_s12 = vpop.sfrf %217 }
 0x124   :  { %p342_p12 = scmp.ne.s32.totalorder %s218_s12, 0 }
 0x126   :  { %222 = shalt.err (%p342_p12)  }
 0x127   :  { %224 = vsyncmov [#allocation3 + $0x4] }
 0x12a   :  { %s225_s13 = vpop.sfrf %224 }
 0x12b   :  { %p343_p13 = scmp.ne.s32.totalorder %s225_s13, 0 }
 0x12d   :  { %229 = shalt.err (%p343_p13)  }
 0x12e   :  { %231 = vsyncmov [#allocation3 + $0x5] }
 0x131   :  { %s232_s4 = vpop.sfrf %231 }
 0x132   :  { %p344_p0 = scmp.ne.s32.totalorder %s232_s4, 0 }
 0x134   :  { %236 = shalt.err (%p344_p0)  }
 0x135   :  { %238 = vsyncmov [#allocation3 + $0x6] }
 0x138   :  { %s239_s14 = vpop.sfrf %238 }
 0x139   :  { %p345_p1 = scmp.ne.s32.totalorder %s239_s14, 0 }
 0x13b   :  { %243 = shalt.err (%p345_p1)  }
 0x13c   :  { %245 = vsyncmov [#allocation3 + $0x7] }
 0x13f   :  { %s246_s15 = vpop.sfrf %245 }
 0x140   :  { %p346_p2 = scmp.ne.s32.totalorder %s246_s15, 0 }
 0x142   :  { %250 = shalt.err (%p346_p2)  }
 0x143   :  { %252 = vsyncmov [#allocation3 + $0x8] }
 0x146   :  { %s253_s16 = vpop.sfrf %252 }
 0x147   :  { %p347_p3 = scmp.ne.s32.totalorder %s253_s16, 0 }
 0x149   :  { %257 = shalt.err (%p347_p3)  }
 0x14a   :  { %259 = vsyncmov [#allocation3 + $0x9] }
 0x14d   :  { %s260_s17 = vpop.sfrf %259 }
 0x14e   :  { %p348_p4 = scmp.ne.s32.totalorder %s260_s17, 0 }
 0x150   :  { %264 = shalt.err (%p348_p4)  }
 0x151   :  { %266 = vsyncmov [#allocation3 + $0xa] }
 0x154   :  { %s267_s18 = vpop.sfrf %266 }
 0x155   :  { %p349_p5 = scmp.ne.s32.totalorder %s267_s18, 0 }
 0x157   :  { %271 = shalt.err (%p349_p5)  }
 0x158   :  { %273 = vsyncmov [#allocation3 + $0xb] }
 0x15b   :  { %s274_s19 = vpop.sfrf %273 }
 0x15c   :  { %p350_p6 = scmp.ne.s32.totalorder %s274_s19, 0 }
 0x15e   :  { %278 = shalt.err (%p350_p6)  }
 0x15f   :  { %280 = vsyncmov [#allocation3 + $0xc] }
 0x162   :  { %s281_s20 = vpop.sfrf %280 }
 0x163   :  { %p351_p7 = scmp.ne.s32.totalorder %s281_s20, 0 }
 0x165   :  { %285 = shalt.err (%p351_p7)  }
 0x166   :  { %287 = vsyncmov [#allocation3 + $0xd] }
 0x169   :  { %s288_s21 = vpop.sfrf %287 }
 0x16a   :  { %p352_p8 = scmp.ne.s32.totalorder %s288_s21, 0 }
 0x16c   :  { %292 = shalt.err (%p352_p8)  }
 0x16d   :  { %294 = vsyncmov [#allocation3 + $0xe] }
 0x170   :  { %s295_s0 = vpop.sfrf %294 }
 0x171   :  { %p353_p9 = scmp.ne.s32.totalorder %s295_s0, 0 }
 0x173   :  { %299 = shalt.err (%p353_p9)  }
 0x174   :  { %301 = vsyncmov [#allocation3 + $0xf] }
 0x177   :  { %s302_s22 = vpop.sfrf %301 }
 0x178   :  { %p354_p10 = scmp.ne.s32.totalorder %s302_s22, 0 }
 0x17a   :  { %306 = shalt.err (%p354_p10)  }

// kernel: decoder_forward.5
= control target key start
LH: loop header
LB: loop body
LE: loop exit
PB: predicated region body
PF: predicated region fallthrough
CT: control target
= control target key end

     0   :  { %vm27_vm0 = vcmask 261120   ;;  %vm109_vm1 = vcmask 523264   ;;  %s231_s1 = inlined_call_operand.vmem [shape: f32[32,64], index: 1, kind: input, shape index: {}]   ;;  %s232_s0 = inlined_call_operand.vmem [shape: f32[16,32], index: 0, kind: input, shape index: {}]   ;;  %s233_s2 = inlined_call_operand.vmem [shape: f32[1,64], index: 2, kind: input, shape index: {}]   ;;  %s234_s3 = inlined_call_operand.vmem [shape: f32[16,64], index: 3, kind: output, shape index: {}]  }
   0x1   :  { %v16_v0 = vld [vmem:[%s231_s1] sm:$0xff]  ;;  %v17_v1 = vld [vmem:[%s231_s1 + $0x8] sm:$0xff]  ;;  %v18_v2 = vld [vmem:[%s231_s1 + $0x10] sm:$0xff] }
   0x2   :  { %v162_v3 = vpack.c.bf16 %v17_v1, %v16_v0  ;;  %v19_v4 = vld [vmem:[%s231_s1 + $0x18] sm:$0xff]  ;;  %v14_v5 = vld [vmem:[%s232_s0] sm:$0xff]  ;;  %v15_v7 = vld [vmem:[%s232_s0 + $0x8] sm:$0xff] }
   0x3   :  { %v166_v6 = vpack.c.bf16 %v19_v4, %v18_v2  ;;  %159 = vmatprep.mubr.msk.f32.mxu0 %vm27_vm0, %v14_v5  ;;  %v142_v8 = vld [vmem:[%s233_s2] ss:$0 sm:$0xff] }
   0x4   :  { %163 = vmatprep.subr.bf16.mxu0 %v162_v3 }
   0x5   :  { %165 = vmatpush3.bf16.msra.mxu0 %v162_v3 }
   0x6   :  { %167 = vmatprep.subr.bf16.mxu0 %v166_v6 }
   0x9   :  { %169 = vmatpush3.bf16.msra.mxu0 %v166_v6 }
   0xc   :  { %160 = vmatmul.mubr.msk.f32.vlgmr.msra.gmra.mrb[0].mxu0 %vm27_vm0, %v15_v7 }
  0xdf   :  { %v161_v9 = vpop.f32.mrb[0].mxu0 }
  0xe0   :  { %v100_v10 = vpop.f32.mrb[1].mxu0  ;;  %v106_v12 = vadd.f32 %v161_v9, %v142_v8 }
  0xe1   :  { %v101_v11 = vadd.f32 %v142_v8, %v100_v10 }
  0xe2   :  { %v113_v14 = vsel %vm109_vm1, %v106_v12, -inf }
  0xe3   :  { %v110_v13 = vsel %vm109_vm1, %v101_v11, -inf }
  0xe4   :  { %111 = vmax.xlane.f32.xlu0 %v110_v13 }
  0xe8   :  { %114 = vmax.xlane.f32.xlu0 %v113_v14 }
 0x171   :  { %v112_v15 = vpop.xlane.xlu0 %111 }
 0x172   :  { %v116_v16 = vsub.f32 %v101_v11, %v112_v15 }
 0x174   :  { %v118_v17 = vmul.f32 1.442695, %v116_v16 }
 0x175   :  { %v115_v18 = vpop.xlane.xlu0 %114 }
 0x176   :  { %170 = vpow2.f32 %v118_v17  ;;  %v117_v19 = vsub.f32 %v106_v12, %v115_v18 }
 0x178   :  { %v120_v20 = vmul.f32 1.442695, %v117_v19 }
 0x17a   :  { %172 = vpow2.f32 %v120_v20 }
 0x180   :  { %v171_v21 = vpop.eup %170 }
 0x181   :  { %v122_v22 = vsel %vm109_vm1, %v171_v21, 0.0 }
 0x182   :  { %123 = vadd.xlane.f32.xlu1 %v122_v22 }
 0x184   :  { %v173_v23 = vpop.eup %172 }
 0x185   :  { %v125_v24 = vsel %vm109_vm1, %v173_v23, 0.0 }
 0x186   :  { %126 = vadd.xlane.f32.xlu1 %v125_v24 }
 0x20f   :  { %v124_v25 = vpop.xlane.xlu1 %123 }
 0x210   :  { %174 = vlog2.f32 %v124_v25 }
 0x213   :  { %v127_v26 = vpop.xlane.xlu1 %126 }
 0x214   :  { %176 = vlog2.f32 %v127_v26 }
 0x21a   :  { %v175_v27 = vpop.eup %174 }
 0x21b   :  { %v129_v28 = vmul.f32 0.6931472, %v175_v27 }
 0x21d   :  { %v132_v29 = vadd.f32 %v129_v28, %v112_v15 }
 0x21e   :  { %v177_v30 = vpop.eup %176 }
 0x21f   :  { %v134_v31 = vsub.f32 %v101_v11, %v132_v29  ;;  %v131_v32 = vmul.f32 0.6931472, %v177_v30 }
 0x221   :  { %136 = vst.msk [vmem:[%s234_s3] sm:$0xff] %vm109_vm1, %v134_v31  ;;  %v133_v33 = vadd.f32 %v131_v32, %v115_v18 }
 0x223   :  { %v135_v34 = vsub.f32 %v106_v12, %v133_v33 }
 0x225   :  { %137 = vst.msk [vmem:[%s234_s3 + $0x8] sm:$0xff] %vm109_vm1, %v135_v34 }

// kernel: decoder_forward.4
= control target key start
LH: loop header
LB: loop body
LE: loop exit
PB: predicated region body
PF: predicated region fallthrough
CT: control target
= control target key end

     0   :  { %14 = vsyncpa [#allocation3], 0  ;;  %s1070_s0 = inlined_call_operand.vmem [shape: f32[8,2,128], index: 0, kind: input, shape index: {}]   ;;  %s1071_s1 = inlined_call_operand.vmem [shape: f32[32,128], index: 1, kind: input, shape index: {}]   ;;  %s1072_s2 = inlined_call_operand.vmem [shape: f32[1,64,128], index: 2, kind: input, shape index: {}]   ;;  %s1073_s3 = inlined_call_operand.vmem [shape: f32[2,1,128], index: 3, kind: input, shape index: {}]   ;;  %s1074_s4 = inlined_call_operand.vmem [shape: f32[2,2,32], index: 4, kind: input, shape index: {}]   ;;  %s1075_s5 = inlined_call_operand.vmem [shape: f32[2,2,32], index: 5, kind: input, shape index: {}]   ;;  %s1076_s6 = inlined_call_operand.vmem [shape: f32[8,2,32], index: 6, kind: output, shape index: {0}]   ;;  %s1077_s7 = inlined_call_operand.hbm [shape: f32[2,2,32], index: 7, kind: output, shape index: {1}]   ;;  %s1078_s8 = inlined_call_operand.hbm [shape: f32[2,2,32], index: 8, kind: output, shape index: {2}]  }
   0x1   :  { %15 = vsyncpa [#allocation5], 0  ;;  %s922_s27 = smov 0  }
   0x2 LB: > { %s928_s28 = sadd.s32 4294967295, %s866_s27   ;;  %p677_p0 = scmp.ge.s32.totalorder %s866_s27, 1  ;;  %s866_s27 = sphi %s922_s27, %s21_s27  }
   0x3   : > { %p258_p1 = scmp.lt.s32.totalorder %s866_s27, 9 }
   0x5   : > { %p259_p2 = pnand %p677_p0, %p258_p1 }
   0x6   : > { %p290_p3 = scmp.lt.s32.totalorder (!%p259_p2), %s928_s28, 7  ;;  %p680_p4 = scmp.ne.s32.totalorder (!%p259_p2), %s928_s28, 0 }
   0x7   : > { %262 = sbr.rel (%p259_p2) target bundleno = 1456 (0x5b0), region = 44 }
   0xe   : > { %s291_s29 = scalar_select %p290_p3, %s928_s28, 7 }
   0xf   : > { %301 = sbr.rel (%p680_p4) target bundleno = 22 (0x16), region = 48  ;;  %v302_v0 = vld [vmem:[%s1074_s4] sm:$0x3] (!%p680_p4)  ;;  %vm304_vm0 = vcmask (!%p680_p4), 254976   ;;  %v303_v1 = vld [vmem:[%s1074_s4 + $0x2] sm:$0x3] (!%p680_p4) }
  0x10   : > { %s678_s30 = sshll.u32 %s291_s29, 1  ;;  %305 = vst.msk [vmem:[#allocation2] sm:$0x3] (!%p680_p4), %vm304_vm0, %v302_v0  ;;  %306 = vst.msk [vmem:[#allocation2 + $0x2] sm:$0x3] (!%p680_p4), %vm304_vm0, %v303_v1 }
  0x11   : > { %s937_s11 = scalar_lea.vmem %s1070_s0, %s678_s30  ;;  %s942_s14 = scalar_lea.vmem %s1076_s6, %s678_s30  ;;  %v307_v2 = vld [vmem:[%s1075_s5] sm:$0x3] (!%p680_p4)  ;;  %v308_v3 = vld [vmem:[%s1075_s5 + $0x2] sm:$0x3] (!%p680_p4) }
  0x12   : > { %309 = vst.msk [vmem:[#allocation4] sm:$0x3] (!%p680_p4), %vm304_vm0, %v307_v2  ;;  %310 = vst.msk [vmem:[#allocation4 + $0x2] sm:$0x3] (!%p680_p4), %vm304_vm0, %v308_v3 }
  0x16 PF: > { %v313_v4 = vld [vmem:[%s1071_s1] sm:$0xff]  ;;  %v314_v5 = vld [vmem:[%s1071_s1 + $0x8] sm:$0xff]  ;;  %v315_v6 = vld [vmem:[%s1071_s1 + $0x10] sm:$0xff]  ;;  %v868_v7 = vmov 0.0|0.0   ;;  %vm869_vm1 = vmmov 0   ;;  %v870_v10 = vmov 0.0  }
  0x17   : > { %737 = vmatprep.subr.bf16.mxu0 %v868_v7  ;;  %v738_v8 = vpack.c.bf16 %v314_v5, %v313_v4  ;;  %v316_v9 = vld [vmem:[%s1071_s1 + $0x18] sm:$0xff]  ;;  %715 = vmatprep.mubr.msk.f32.mxu0 %vm869_vm1, %v870_v10  ;;  %v312_v12 = vld [vmem:[#allocation2] sm:$0x3]  ;;  %vm317_vm2 = vcmask 261120   ;;  %s871_s12 = smov 64   ;;  %s872_s13 = smov 32  }
  0x18   : > { %743 = vmatprep.subr.bf16.mxu1 %v868_v7  ;;  %734 = vmatprep.mubr.msk.f32.mxu1 %vm869_vm1, %v870_v10  ;;  %v741_v11 = vpack.c.bf16 %v316_v9, %v315_v6  ;;  %v311_v13 = vld [vmem:[%s937_s11] sm:$0x3]  ;;  %v440_v30 = vld [vmem:[%s1072_s2 + $0x8] sm:$0xff]  ;;  %v441_v31 = vld [vmem:[%s1072_s2 + $0x10] sm:$0xff]  ;;  %vm425_vm3 = vcmask 254976   ;;  %vm455_vm4 = vcmask 523264  }
  0x19   : > { %739 = vmatpush3.bf16.msra.mxu0 %v738_v8  ;;  %v392_v18 = vld [vmem:[#allocation4] sm:$0x3]  ;;  %v442_v33 = vld [vmem:[%s1072_s2 + $0x18] sm:$0xff]  ;;  %v444_v36 = vld [vmem:[%s1072_s2 + $0x28] sm:$0xff]  ;;  %s873_s15 = smov 96   ;;  %p763_p5 = scmp.eq.s32.totalorder %s928_s28, 7 }
  0x1a   : > { %740 = vmatprep.subr.bf16.mxu0 %v868_v7  ;;  %v439_v29 = vld [vmem:[%s1072_s2] sm:$0xff]  ;;  %v747_v34 = vpack.c.bf16 %v442_v33, %v441_v31  ;;  %v445_v38 = vld [vmem:[%s1072_s2 + $0x30] sm:$0xff]  ;;  %v446_v39 = vld [vmem:[%s1072_s2 + $0x38] sm:$0xff]  ;;  %s874_s16 = smov [#allocation4]  }
  0x1b   : > { %v744_v32 = vpack.c.bf16 %v440_v30, %v439_v29  ;;  %v443_v35 = vld [vmem:[%s1072_s2 + $0x20] sm:$0xff]  ;;  %v753_v41 = vpack.c.bf16 %v446_v39, %v445_v38  ;;  %s596_s17 = sshll.u32 %s874_s16, 4  ;;  %s597_s17 = int_to_ptr.vmem [resolvable:$true] %s596_s17 }
  0x1c   : > { %v750_v37 = vpack.c.bf16 %v444_v36, %v443_v35  ;;  %v433_v42 = vld [vmem:[#allocation2 + $0x2] sm:$0x3]  ;;  %v530_v43 = vld [vmem:[#allocation4 + $0x2] sm:$0x3]  ;;  %v684_v49 = vld [vmem:[%s1073_s3 + $0x1] ss:$0 sm:$0xff]  ;;  %p807_p9 = scmp.lt.s32.totalorder %s597_s17, %s597_s17 }
  0x1d   : > { %742 = vmatpush3.bf16.msra.mxu0 %v741_v11  ;;  %745 = vmatpush3.bf16.msra.mxu1 %v744_v32  ;;  %s800_s18 = scalar_lea.vmem %s597_s17, 64 }
  0x1e   : > { %746 = vmatprep.subr.bf16.mxu1 %v868_v7  ;;  %p801_p6 = scmp.ne.s32.totalorder %s597_s17, %s800_s18  ;;  %p808_p10 = scmp.lt.s32.totalorder %s800_s18, %s800_s18 }
  0x20   : > { %716 = vmatmul.mubr.msk.f32.vlgmr.msra.gmra.mrb[0].mxu0 %vm317_vm2, %v312_v12  ;;  %p802_p7 = pnand %p801_p6, %p763_p5  ;;  %p809_p11 = por %p808_p10, %p807_p9 }
  0x21   : > { %748 = vmatpush3.bf16.msra.mxu1 %v747_v34 }
  0x22   : > { %749 = vmatprep.subr.bf16.mxu1 %v868_v7  ;;  %p803_p8 = pneg %p802_p7 }
  0x24   : > { %p810_p12 = pnand %p809_p11, %p803_p8 }
  0x25   : > { %751 = vmatpush3.bf16.msra.mxu1 %v750_v37 }
  0x26   : > { %752 = vmatprep.subr.bf16.mxu1 %v868_v7 }
  0x29   : > { %754 = vmatpush3.bf16.msra.mxu1 %v753_v41 }
  0xf3   : > { %v387_v14 = vpop.f32.mrb[0].mxu0 }
  0xf4   : > { %v391_v15 = vadd.f32 %v387_v14, %v311_v13  ;;  %v717_v16 = vpop.f32.mrb[1].mxu0 }
  0xf6   : > { %784 = vtanh.f32 %v391_v15  ;;  %v682_v19 = vmul.f32 -1.442695, %v391_v15 }
  0xf8   : > { %786 = vpow2.f32 %v682_v19 }
 0x100   : > { %v785_v17 = vpop.eup %784 }
 0x101   : > { %406 = vrot.lane.b32.xlu0 %v785_v17, %s871_s12 }
 0x102   : > { %v787_v20 = vpop.eup %786 }
 0x103   : > { %v396_v21 = vadd.f32 1.0, %v787_v20 }
 0x105   : > { %401 = vrot.lane.b32.xlu0 %v392_v18, %s872_s13  ;;  %788 = vrcp.f32 %v396_v21 }
 0x10f   : > { %v789_v22 = vpop.eup %788 }
 0x173   : > { %v407_v23 = vpop.permute.xlu0 %406 }
 0x174   : > { %v409_v24 = vmul.f32 %v789_v22, %v407_v23 }
 0x176   : > { %411 = vrot.lane.b32.xlu1 %v409_v24, %s872_s13 }
 0x177   : > { %v402_v25 = vpop.permute.xlu0 %401 }
 0x178   : > { %v404_v26 = vmul.f32 %v789_v22, %v402_v25 }
 0x1e8   : > { %v412_v27 = vpop.permute.xlu1 %411 }
 0x1e9   : > { %v414_v28 = vadd.f32 %v412_v27, %v404_v26 }
 0x1eb   : > { %790 = vtanh.f32 %v414_v28 }
 0x1f5   : > { %v791_v40 = vpop.eup %790 }
 0x1f6   : > { %417 = vrot.lane.b32.xlu1 %v791_v40, %s871_s12 }
 0x1fa   : > { %435 = vrot.lane.b32.xlu1 %v433_v42, %s872_s13 }
 0x1fe   : > { %539 = vrot.lane.b32.xlu1 %v530_v43, %s872_s13 }
 0x268   : > { %v418_v44 = vpop.permute.xlu1 %417 }
 0x269   : > { %v420_v45 = vmul.f32 %v789_v22, %v418_v44 }
 0x26b   : > { %422 = vrot.lane.b32.xlu0 %v420_v45, %s872_s13 }
 0x26c   : > { %v436_v46 = vpop.permute.xlu1 %435 }
 0x270   : > { %v540_v60 = vpop.permute.xlu1 %539 }
 0x2dd   : > { %v423_v47 = vpop.permute.xlu0 %422 }
 0x2de   : > { %426 = vst.msk [vmem:[#allocation2] sm:$0x3] %vm425_vm3, %v423_v47  ;;  %v438_v48 = vsel %vm317_vm2, %v423_v47, %v436_v46 }
 0x2df   : > { %735 = vmatmul.mubr.msk.f32.vlgmr.msra.gmra.mrb[0].mxu1 %vm455_vm4, %v438_v48 }
 0x3b2   : > { %v525_v50 = vpop.f32.mrb[0].mxu1 }
 0x3b3   : > { %v526_v51 = vadd.f32 %v684_v49, %v525_v50  ;;  %v736_v52 = vpop.f32.mrb[1].mxu1 }
 0x3b5   : > { %792 = vtanh.f32 %v526_v51  ;;  %v686_v54 = vmul.f32 -1.442695, %v526_v51 }
 0x3b7   : > { %794 = vpow2.f32 %v686_v54 }
 0x3bf   : > { %v793_v53 = vpop.eup %792 }
 0x3c0   : > { %544 = vrot.lane.b32.xlu0 %v793_v53, %s871_s12 }
 0x3c1   : > { %v795_v55 = vpop.eup %794 }
 0x3c2   : > { %v534_v56 = vadd.f32 1.0, %v795_v55 }
 0x3c4   : > { %796 = vrcp.f32 %v534_v56 }
 0x3ce   : > { %v797_v57 = vpop.eup %796 }
 0x3cf   : > { %v542_v61 = vmul.f32 %v797_v57, %v540_v60 }
 0x432   : > { %v545_v58 = vpop.permute.xlu0 %544 }
 0x433   : > { %v547_v59 = vmul.f32 %v797_v57, %v545_v58 }
 0x435   : > { %549 = vrot.lane.b32.xlu0 %v547_v59, %s872_s13 }
 0x439   : > { %428 = vrot.lane.b32.xlu0 %v414_v28, %s873_s15 }
 0x4a7   : > { %v550_v62 = vpop.permute.xlu0 %549 }
 0x4a8   : > { %v552_v63 = vadd.f32 %v550_v62, %v542_v61 }
 0x4aa   : > { %798 = vtanh.f32 %v552_v63  ;;  %565 = vrot.lane.b32.xlu0 %v552_v63, %s873_s15 }
 0x4ab   : > { %v429_v0 = vpop.permute.xlu0 %428 }
 0x4ac   : > { %431 = vst.msk [vmem:[#allocation4] sm:$0x3] %vm425_vm3, %v429_v0 }
 0x4b4   : > { %v799_v1 = vpop.eup %798 }
 0x4b5   : > { %555 = vrot.lane.b32.xlu1 %v799_v1, %s871_s12 }
 0x51c   : > { %v566_v2 = vpop.permute.xlu0 %565 }
 0x51d   : > { %568 = vst.msk [vmem:[#allocation4 + $0x2] sm:$0x3] %vm425_vm3, %v566_v2 }
 0x51e   : > { %813 = shalt.err (!%p810_p12)
}
 0x51f   : > { %s814_s12 = scalar_lea.hbm %s1078_s8, 64 }
 0x520   : > { %p815_p13 = scmp.ne.s32.totalorder %s1078_s8, %s814_s12  ;;  %p820_p2 = scmp.lt.u32.totalorder %s814_s12, %s1078_s8 }
 0x522   : > { %p816_p0 = pnand %p815_p13, %p763_p5 }
 0x524   : > { %p817_p1 = pneg %p816_p0 }
 0x526   : > { %p822_p3 = pnand %p820_p2, %p817_p1 }
 0x528   : > { %825 = shalt.err (!%p822_p3)
}
 0x529   : > { %s875_s25 = smov 2   ;;  %v556_v3 = vpop.permute.xlu1 %555  ;;  %s876_s30 = smov [#allocation2]  }
 0x52a   : > { %758 = dma.vmem_to_hbm [thread:$0]  (%p763_p5), %s597_s17, 64, %s1078_s8, [#allocation5], %s872_s13, %s872_s13, %s875_s25   ;;  %v558_v4 = vmul.f32 %v797_v57, %v556_v3 }
 0x52b   : > { %s583_s9 = sshll.u32 %s876_s30, 4  ;;  %s584_s9 = int_to_ptr.vmem [resolvable:$true] %s583_s9 }
 0x52c   : > { %560 = vrot.lane.b32.xlu1 %v558_v4, %s872_s13  ;;  %s826_s10 = scalar_lea.vmem %s584_s9, 64  ;;  %p833_p8 = scmp.lt.s32.totalorder %s584_s9, %s584_s9 }
 0x52d   : > { %p827_p4 = scmp.ne.s32.totalorder %s584_s9, %s826_s10  ;;  %p834_p9 = scmp.lt.s32.totalorder %s826_s10, %s826_s10 }
 0x52f   : > { %p828_p6 = pnand %p827_p4, %p763_p5  ;;  %p835_p10 = por %p834_p9, %p833_p8 }
 0x531   : > { %p829_p7 = pneg %p828_p6 }
 0x533   : > { %p836_p11 = pnand %p835_p10, %p829_p7 }
 0x59e   : > { %v561_v5 = vpop.permute.xlu1 %560 }
 0x59f   : > { %563 = vst.msk [vmem:[#allocation2 + $0x2] sm:$0x3] %vm425_vm3, %v561_v5  ;;  %569 = vst.msk [vmem:[%s942_s14] sm:$0x3] %vm425_vm3, %v561_v5 }
 0x5a0   : > { %839 = shalt.err (!%p836_p11)
}
 0x5a1   : > { %s840_s16 = scalar_lea.hbm %s1077_s7, 64 }
 0x5a2   : > { %p841_p12 = scmp.ne.s32.totalorder %s1077_s7, %s840_s16  ;;  %p846_p1 = scmp.lt.u32.totalorder %s840_s16, %s1077_s7 }
 0x5a4   : > { %p842_p13 = pnand %p841_p12, %p763_p5 }
 0x5a6   : > { %p843_p0 = pneg %p842_p13 }
 0x5a8   : > { %p848_p2 = pnand %p846_p1, %p843_p0 }
 0x5aa   : > { %851 = shalt.err (!%p848_p2)
}
 0x5ab   : > { %756 = dma.vmem_to_hbm [thread:$0]  (%p763_p5), %s584_s9, 64, %s1077_s7, [#allocation3], %s872_s13, %s872_s13, %s875_s25  }
 0x5ac   : > { %857 = dma.done.wait (%p763_p5), [#allocation3], 64  }
 0x5ad   : > { %859 = vsyncadd (%p763_p5), [#allocation3], 4294967232 }
 0x5ae   : > { %861 = dma.done.wait (%p763_p5), [#allocation5], 64  }
 0x5af   : > { %863 = vsyncadd (%p763_p5), [#allocation5], 4294967232 }
 0x5b0 PF: > { %s21_s27 = sadd.s32 1, %s866_s27  }
 0x5b1   : > { %p18_p3 = scmp.ge.s32.totalorder %s21_s27, 10  }
 0x5b3   :  { %20 = sbr.rel (!%p18_p3) target bundleno = 2 (0x2), region = 98 }
 0x5ba   :  { %623 = vsyncpa [#allocation3], 1 }
 0x5bb   :  { %625 = vsyncpa [#allocation3 + $0x1], 1 }
 0x5bc   :  { %626 = vsyncpa [#allocation5], 1 }

</bundles_post_ra>
